<compile_context>
chip_gen: v7x
topology: tpu7x:2x2x1
jax: 0.10.0
libtpu: 0.0.40
codegen_flags: <defaults>
</compile_context>

<pallas_src>
import math

import jax
import jax.numpy as jnp
from jax.experimental import pallas as pl
from jax.experimental.pallas import tpu as pltpu  # noqa: F401

# ----------------------------- configuration -------------------------------
HIDDEN_SIZE = 32
NUM_HEADS = 4
HEAD_DIM = HIDDEN_SIZE // NUM_HEADS
BATCH = 2
SEQ = 8
DROPOUT_PROB = 0.2  # unused at inference (identity)


def _self_attention_kernel(x_ref, w_ref, o_ref):
    """Whole problem in one invocation.

    x_ref : [B*S, H]      bf16 flattened hidden states
    w_ref : [NH, H, 3*D]  bf16 head-major fused Q|K|V weights (scale in Q cols)
    o_ref : [NH*B, S, D]  f32 head-major context (single full-block store)
    """
    NH, B, S, D, H = NUM_HEADS, BATCH, SEQ, HEAD_DIM, HIDDEN_SIZE
    M = B * S

    x = x_ref[...]                                            # [M, H]   bf16
    w = w_ref[...]                                            # [NH,H,3D] bf16

    # Head-batched fused QKV projection: one 3-D batched MXU matmul
    # (same total FLOPs as the [M,H]@[H,3H] form, but yields head-major output
    #  so per-head extraction below needs no lane-splitting relayout).
    xb = jnp.broadcast_to(x[None, :, :], (NH, M, H))          # leading-dim bcast
    qkv = jnp.einsum('nmh,nhd->nmd', xb, w,
                     preferred_element_type=jnp.float32)      # [NH, M, 3D] f32
    qkv = qkv.astype(jnp.bfloat16)

    q = qkv[:, :, 0:D]                                        # [NH, M, D]
    k = qkv[:, :, D:2 * D]
    v = qkv[:, :, 2 * D:3 * D]

    # [NH, B*S, D] -> [NH*B, S, D]: sublane-tile-aligned split (S == 8) plus a
    # leading-dim merge -- no lane relayout.
    q = q.reshape(NH * B, S, D)
    k = k.reshape(NH * B, S, D)
    v = v.reshape(NH * B, S, D)

    # Batched scores for every (head, batch) at once.  The 1/sqrt(D) scale is
    # already folded into the Q weight columns.
    scores = jnp.einsum('nqd,nkd->nqk', q, k,
                        preferred_element_type=jnp.float32)   # [NH*B, S, S] f32

    # ONE softmax over the whole score tensor (all elementwise math in f32).
    m = jnp.max(scores, axis=-1, keepdims=True)
    p = jnp.exp(scores - m)
    inv = pl.reciprocal(jnp.sum(p, axis=-1, keepdims=True), approx=True)
    p = p * inv

    # TODO(synk): training-mode dropout on attention probs (torch RNG stream)
    # has no clean Pallas equivalent; eval-mode identity here.

    ctx = jnp.einsum('nqk,nkd->nqd', p.astype(jnp.bfloat16), v,
                     preferred_element_type=jnp.float32)      # [NH*B, S, D] f32

    o_ref[...] = ctx.astype(o_ref.dtype)                      # single store


@jax.jit
def self_attention(hidden_states, wq, wk, wv):
    """hidden_states: [B, S, H] float32.  wq/wk/wv: torch-style [out, in] weights."""
    B, S, H = hidden_states.shape
    NH, D = NUM_HEADS, HEAD_DIM
    scale = 1.0 / math.sqrt(D)

    # Flatten batch*seq and feed the MXU bf16 (halves the x / weight DMA bytes).
    x2d = hidden_states.reshape(B * S, H).astype(jnp.bfloat16)

    # Head-major fused QKV weight [NH, H, 3D]; fold 1/sqrt(D) into the Q block
    # while we are already assembling it (free -- no extra XLA op at runtime).
    def per_head(w):  # torch [out, in] -> [NH, H(in), D]
        return w.T.reshape(H, NH, D).transpose(1, 0, 2)

    w3 = jnp.concatenate(
        [per_head(wq) * scale, per_head(wk), per_head(wv)], axis=-1
    ).astype(jnp.bfloat16)                                    # [NH, H, 3D]

    flops = 2 * (B * S) * H * (3 * H) + 2 * 2 * (NH * B) * S * S * D
    transcendentals = (NH * B) * S * S + (NH * B) * S         # exp + reciprocal
    bytes_accessed = x2d.size * 2 + w3.size * 2 + (NH * B * S * D) * 4

    out3 = pl.pallas_call(
        _self_attention_kernel,
        out_shape=jax.ShapeDtypeStruct((NH * B, S, D), jnp.float32),
        in_specs=[
            pl.BlockSpec((B * S, H), lambda: (0, 0)),
            pl.BlockSpec((NH, H, 3 * D), lambda: (0, 0, 0)),
        ],
        out_specs=pl.BlockSpec((NH * B, S, D), lambda: (0, 0, 0)),
        cost_estimate=pl.CostEstimate(
            flops=flops,
            transcendentals=transcendentals,
            bytes_accessed=bytes_accessed),
    )(x2d, w3)

    # Head-major [NH, B, S, D] -> [B, S, H]; tiny wrapper-side relayout in XLA.
    out = out3.reshape(NH, B, S, D).transpose(1, 2, 0, 3).reshape(B, S, H)
    return out.astype(hidden_states.dtype)


def _reference(hidden_states, wq, wk, wv):
    """Pure-JAX f32 reference mirroring the PyTorch forward (eval mode)."""
    B, S, H = hidden_states.shape
    q = hidden_states @ wq.T
    k = hidden_states @ wk.T
    v = hidden_states @ wv.T

    def split_heads(t):  # [B, S, H] -> [B, nh, S, D]
        return t.reshape(B, S, NUM_HEADS, HEAD_DIM).transpose(0, 2, 1, 3)

    qh, kh, vh = split_heads(q), split_heads(k), split_heads(v)
    scores = jnp.einsum("bhqd,bhkd->bhqk", qh, kh) / math.sqrt(HEAD_DIM)
    probs = jax.nn.softmax(scores, axis=-1)
    ctx = jnp.einsum("bhqk,bhkd->bhqd", probs, vh)            # [B, nh, S, D]
    ctx = ctx.transpose(0, 2, 1, 3).reshape(B, S, H)          # [B, S, H]
    return ctx


if __name__ == "__main__":
    key = jax.random.PRNGKey(0)
    kx, kq, kk, kv = jax.random.split(key, 4)

    hidden_states = jax.random.normal(kx, (BATCH, SEQ, HIDDEN_SIZE), dtype=jnp.float32)
    # Deterministic "Linear" weights, torch layout [out_features, in_features].
    bound = 1.0 / math.sqrt(HIDDEN_SIZE)
    wq = jax.random.uniform(kq, (HIDDEN_SIZE, HIDDEN_SIZE), jnp.float32, -bound, bound)
    wk = jax.random.uniform(kk, (HIDDEN_SIZE, HIDDEN_SIZE), jnp.float32, -bound, bound)
    wv = jax.random.uniform(kv, (HIDDEN_SIZE, HIDDEN_SIZE), jnp.float32, -bound, bound)

    out = self_attention(hidden_states, wq, wk, wv)
    out = jax.block_until_ready(out)

    ref = _reference(hidden_states, wq, wk, wv)
    assert out.shape == (BATCH, SEQ, HIDDEN_SIZE)
    # Tolerance covers bf16 MXU operands (rel err ~1e-2 worst case through the
    # projection/attention chain) plus the EUP approximate reciprocal (~1e-4).
    assert jnp.allclose(out, ref, rtol=3e-2, atol=3e-2), "kernel/reference mismatch"

    print("KERNEL_OK")
</pallas_src>

<mosaic_0001>
module attributes {stable_mosaic.version = 11 : i64} {
  func.func @_self_attention_kernel(%arg0: memref<16x32xbf16, #tpu.memory_space<vmem>>, %arg1: memref<4x32x24xbf16, #tpu.memory_space<vmem>>, %arg2: memref<8x8x8xf32, #tpu.memory_space<vmem>>) attributes {dimension_semantics = [], scalar_prefetch = 0 : i64, scratch_operands = 0 : i64, tpu.core_type = #tpu.core_type<tc>} {
    %c0 = arith.constant 0 : index
    %c0_0 = arith.constant 0 : index
    %0 = vector.load %arg0[%c0, %c0_0] : memref<16x32xbf16, #tpu.memory_space<vmem>>, vector<16x32xbf16>
    %c0_1 = arith.constant 0 : index
    %c0_2 = arith.constant 0 : index
    %c0_3 = arith.constant 0 : index
    %1 = vector.load %arg1[%c0_1, %c0_2, %c0_3] : memref<4x32x24xbf16, #tpu.memory_space<vmem>>, vector<4x32x24xbf16>
    %2 = vector.shape_cast %0 : vector<16x32xbf16> to vector<1x16x32xbf16>
    %3 = vector.shape_cast %2 : vector<1x16x32xbf16> to vector<1x16x32xbf16>
    %4 = vector.broadcast %3 : vector<1x16x32xbf16> to vector<4x16x32xbf16>
    "tpu.trace_start"() <{level = 10 : i32, message = "nmh,nhd->nmd"}> : () -> ()
    %cst = arith.constant dense<0.000000e+00> : vector<4x16x24xf32>
    %5 = tpu.matmul %4, %1, %cst {dimension_numbers = #tpu.dot_dimension_numbers<[2], [1], [1], [2], [0, 0, 0, 1, 1, 2], [0], [0]>} : vector<4x16x32xbf16>, vector<4x32x24xbf16>, vector<4x16x24xf32> -> vector<4x16x24xf32>
    "tpu.trace_stop"() : () -> ()
    %6 = arith.truncf %5 : vector<4x16x24xf32> to vector<4x16x24xbf16>
    %7 = vector.extract_strided_slice %6 {offsets = [0, 0, 0], sizes = [4, 16, 8], strides = [1, 1, 1]} : vector<4x16x24xbf16> to vector<4x16x8xbf16>
    %8 = vector.extract_strided_slice %6 {offsets = [0, 0, 8], sizes = [4, 16, 8], strides = [1, 1, 1]} : vector<4x16x24xbf16> to vector<4x16x8xbf16>
    %9 = vector.extract_strided_slice %6 {offsets = [0, 0, 16], sizes = [4, 16, 8], strides = [1, 1, 1]} : vector<4x16x24xbf16> to vector<4x16x8xbf16>
    %10 = vector.shape_cast %7 : vector<4x16x8xbf16> to vector<8x8x8xbf16>
    %11 = vector.shape_cast %8 : vector<4x16x8xbf16> to vector<8x8x8xbf16>
    %12 = vector.shape_cast %9 : vector<4x16x8xbf16> to vector<8x8x8xbf16>
    "tpu.trace_start"() <{level = 10 : i32, message = "nqd,nkd->nqk"}> : () -> ()
    %cst_4 = arith.constant dense<0.000000e+00> : vector<8x8x8xf32>
    %13 = tpu.matmul %10, %11, %cst_4 {dimension_numbers = #tpu.dot_dimension_numbers<[2], [2], [1], [1], [0, 0, 0, 1, 1, 1], [0], [0]>} : vector<8x8x8xbf16>, vector<8x8x8xbf16>, vector<8x8x8xf32> -> vector<8x8x8xf32>
    "tpu.trace_stop"() : () -> ()
    %cst_5 = arith.constant dense<0xFF800000> : vector<8x8xf32>
    %14 = vector.multi_reduction <maximumf>, %13, %cst_5 [2] : vector<8x8x8xf32> to vector<8x8xf32>
    %15 = vector.shape_cast %14 : vector<8x8xf32> to vector<8x8x1xf32>
    %16 = vector.broadcast %15 : vector<8x8x1xf32> to vector<8x8x8xf32>
    %17 = arith.subf %13, %16 : vector<8x8x8xf32>
    %18 = math.exp %17 : vector<8x8x8xf32>
    %cst_6 = arith.constant dense<0.000000e+00> : vector<8x8xf32>
    %19 = vector.multi_reduction <add>, %18, %cst_6 [2] : vector<8x8x8xf32> to vector<8x8xf32>
    %20 = vector.shape_cast %19 : vector<8x8xf32> to vector<8x8x1xf32>
    %21 = tpu.reciprocal %20 {approx = true} : vector<8x8x1xf32> -> vector<8x8x1xf32>
    %22 = vector.broadcast %21 : vector<8x8x1xf32> to vector<8x8x8xf32>
    %23 = arith.mulf %18, %22 : vector<8x8x8xf32>
    %24 = arith.truncf %23 : vector<8x8x8xf32> to vector<8x8x8xbf16>
    "tpu.trace_start"() <{level = 10 : i32, message = "nqk,nkd->nqd"}> : () -> ()
    %cst_7 = arith.constant dense<0.000000e+00> : vector<8x8x8xf32>
    %25 = tpu.matmul %24, %12, %cst_7 {dimension_numbers = #tpu.dot_dimension_numbers<[2], [1], [1], [2], [0, 0, 0, 1, 1, 2], [0], [0]>} : vector<8x8x8xbf16>, vector<8x8x8xbf16>, vector<8x8x8xf32> -> vector<8x8x8xf32>
    "tpu.trace_stop"() : () -> ()
    %c0_8 = arith.constant 0 : index
    %c0_9 = arith.constant 0 : index
    %c0_10 = arith.constant 0 : index
    %26 = vector.load %arg2[%c0_8, %c0_9, %c0_10] : memref<8x8x8xf32, #tpu.memory_space<vmem>>, vector<8x8x8xf32>
    tpu.vector_store %arg2[%c0_8, %c0_9, %c0_10], %25 {strides = array<i32>} : memref<8x8x8xf32, #tpu.memory_space<vmem>>, vector<8x8x8xf32>,
    return
  }
}

</mosaic_0001>

<bundles_post_ra>
// kernel: self_attention.1
= control target key start
LH: loop header
LB: loop body
LE: loop exit
PB: predicated region body
PF: predicated region fallthrough
CT: control target
= control target key end

     0   :  { %v1415_v0 = vmov 0.0   ;;  %vm1416_vm0 = vmmov 0   ;;  %vm47_vm1 = vcmask 261120   ;;  %s1418_s26 = smov 112   ;;  %vm277_vm2 = vcmask 64512   ;;  %s1684_s1 = inlined_call_operand.vmem [shape: bf16[4,32,24], index: 1, kind: input, shape index: {}]   ;;  %s1685_s0 = inlined_call_operand.vmem [shape: bf16[16,32], index: 0, kind: input, shape index: {}]   ;;  %s1686_s2 = inlined_call_operand.vmem [shape: f32[8,8,8], index: 2, kind: output, shape index: {}]  }
   0x1   :  { %1242 = vmatprep.subr.bf16.mxu0 %v1415_v0  ;;  %v1374_v1 = vld [vmem:[%s1684_s1] sm:$0xff]   ;;  %1250 = vmatprep.subr.bf16.mxu1 %v1415_v0  ;;  %v1375_v2 = vld [vmem:[%s1684_s1 + $0x10] sm:$0xff]   ;;  %v1376_v3 = vld [vmem:[%s1684_s1 + $0x8] sm:$0xff]   ;;  %vm761_vm3 = vcmask 1043456  }
   0x2   :  { %1246 = vmatprep.mubr.msk.bf16.mxu0 %vm1416_vm0, %v1415_v0  ;;  %1254 = vmatprep.mubr.msk.bf16.mxu1 %vm1416_vm0, %v1415_v0  ;;  %v1377_v4 = vld [vmem:[%s1684_s1 + $0x18] sm:$0xff]   ;;  %v1378_v5 = vld [vmem:[%s1685_s0] sm:$0xff]   ;;  %v1381_v7 = vld [vmem:[%s1684_s1 + $0x30] sm:$0xff]  }
   0x3   :  { %1243 = vmatpush3.bf16.msra.mxu0 %v1374_v1  ;;  %1251 = vmatpush3.bf16.msra.mxu1 %v1375_v2  ;;  %v1379_v6 = vld [vmem:[%s1684_s1 + $0x20] sm:$0xff]   ;;  %v1380_v8 = vld [vmem:[%s1684_s1 + $0x28] sm:$0xff]   ;;  %v1382_v9 = vld [vmem:[%s1684_s1 + $0x38] sm:$0xff]   ;;  %s1417_s1 = smov 120  }
   0x4   :  { %1244 = vmatprep.subr.bf16.mxu0 %v1415_v0  ;;  %1252 = vmatprep.subr.bf16.mxu1 %v1415_v0 }
   0x7   :  { %1245 = vmatpush3.bf16.msra.mxu0 %v1376_v3  ;;  %1253 = vmatpush3.bf16.msra.mxu1 %v1377_v4 }
   0x8   :  { %1258 = vmatprep.subr.bf16.mxu0 %v1415_v0  ;;  %1266 = vmatprep.subr.bf16.mxu1 %v1415_v0 }
   0xa   :  { %1247 = vmatmul.mubr.msk.bf16.vlgmr.msra.gmra.mrb[0].mxu0 %vm47_vm1, %v1378_v5  ;;  %1255 = vmatmul.mubr.msk.bf16.vlgmr.msra.gmra.mrb[0].mxu1 %vm47_vm1, %v1378_v5 }
   0xb   :  { %1259 = vmatpush3.bf16.msra.mxu0 %v1379_v6  ;;  %1267 = vmatpush3.bf16.msra.mxu1 %v1381_v7 }
   0xc   :  { %1260 = vmatprep.subr.bf16.mxu0 %v1415_v0  ;;  %1262 = vmatprep.mubr.msk.bf16.mxu0 %vm1416_vm0, %v1415_v0 }
   0xd   :  { %1268 = vmatprep.subr.bf16.mxu1 %v1415_v0  ;;  %1270 = vmatprep.mubr.msk.bf16.mxu1 %vm1416_vm0, %v1415_v0 }
   0xf   :  { %1261 = vmatpush3.bf16.msra.mxu0 %v1380_v8  ;;  %1269 = vmatpush3.bf16.msra.mxu1 %v1382_v9 }
  0x10   :  { %1274 = vmatprep.subr.bf16.mxu0 %v1415_v0  ;;  %1280 = vmatprep.subr.bf16.mxu1 %v1415_v0 }
  0x12   :  { %1263 = vmatmul.mubr.msk.bf16.vlgmr.msra.gmra.mrb[4].mxu0 %vm47_vm1, %v1378_v5  ;;  %1271 = vmatmul.mubr.msk.bf16.vlgmr.msra.gmra.mrb[4].mxu1 %vm47_vm1, %v1378_v5 }
  0x13   :  { %1276 = vmatprep.mubr.msk.bf16.mxu0 %vm1416_vm0, %v1415_v0  ;;  %1282 = vmatprep.mubr.msk.bf16.mxu1 %vm1416_vm0, %v1415_v0 }
  0xdd   :  { %v85_v10 = vpop.f32.mrb[0].mxu0  ;;  %v138_v13 = vpop.f32.mrb[0].mxu1 }
  0xde   :  { %v1190_v11 = vpack.c.bf16 %v85_v10, %v85_v10  ;;  %v1248_v12 = vpop.f32.mrb[1].mxu0  ;;  %v1487_v15 = vpack.c.bf16 %v138_v13, %v138_v13  ;;  %v1256_v16 = vpop.f32.mrb[1].mxu1 }
  0xdf   :  { %v88_v14 = vpop.f32.mrb[2].mxu0  ;;  %v141_v18 = vpop.f32.mrb[2].mxu1 }
  0xe0   :  { %275 = vrot.lane.b32.xlu0 %v1190_v11, %s1417_s1  ;;  %v1249_v17 = vpop.f32.mrb[3].mxu0  ;;  %372 = vrot.lane.b32.xlu1 %v1487_v15, %s1417_s1  ;;  %v1490_v19 = vpack.c.bf16 %v141_v18, %v141_v18  ;;  %v1257_v20 = vpop.f32.mrb[3].mxu1  ;;  %v1492_v21 = vpack.c.bf16 %v88_v14, %v88_v14 }
  0xe4   :  { %324 = vrot.lane.b32.xlu0 %v1492_v21, %s1417_s1  ;;  %420 = vrot.lane.b32.xlu1 %v1490_v19, %s1417_s1 }
  0xe5   :  { %v191_v22 = vpop.f32.mrb[4].mxu0  ;;  %v244_v25 = vpop.f32.mrb[4].mxu1 }
  0xe6   :  { %v1496_v23 = vpack.c.bf16 %v191_v22, %v191_v22  ;;  %v1264_v24 = vpop.f32.mrb[5].mxu0  ;;  %v1272_v27 = vpop.f32.mrb[5].mxu1  ;;  %v1500_v29 = vpack.c.bf16 %v244_v25, %v244_v25 }
  0xe7   :  { %v194_v26 = vpop.f32.mrb[6].mxu0  ;;  %v247_v30 = vpop.f32.mrb[6].mxu1 }
  0xe8   :  { %v1498_v28 = vpack.c.bf16 %v194_v26, %v194_v26  ;;  %468 = vrot.lane.b32.xlu0 %v1496_v23, %s1417_s1  ;;  %v1265_v31 = vpop.f32.mrb[7].mxu0  ;;  %v1273_v32 = vpop.f32.mrb[7].mxu1  ;;  %v1504_v33 = vpack.c.bf16 %v247_v30, %v247_v30 }
  0xea   :  { %516 = vrot.lane.b32.xlu1 %v1498_v28, %s1417_s1 }
  0xec   :  { %564 = vrot.lane.b32.xlu0 %v1500_v29, %s1417_s1 }
  0xee   :  { %612 = vrot.lane.b32.xlu1 %v1504_v33, %s1417_s1 }
  0xf2   :  { %756 = vrot.lane.b32.xlu1 %v1190_v11, %s1418_s26 }
 0x152   :  { %v276_v34 = vpop.permute.xlu0 %275  ;;  %v373_v38 = vpop.permute.xlu1 %372 }
 0x153   :  { %v282_v35 = vsel %vm277_vm2, %v276_v34, 0  ;;  %v378_v39 = vsel %vm277_vm2, %v373_v38, 0 }
 0x154   :  { %1275 = vmatpush3.bf16.xpose.msra.mxu0 %v282_v35 }
 0x155   :  { %1286 = vmatprep.subr.bf16.mxu0 %v1415_v0 }
 0x156   :  { %v325_v36 = vpop.permute.xlu0 %324  ;;  %v421_v40 = vpop.permute.xlu1 %420 }
 0x157   :  { %v330_v37 = vsel %vm277_vm2, %v325_v36, 0  ;;  %v426_v42 = vsel %vm277_vm2, %v421_v40, 0 }
 0x158   :  { %1281 = vmatpush3.bf16.xpose.msra.mxu1 %v330_v37 }
 0x159   :  { %1292 = vmatprep.subr.bf16.mxu1 %v1415_v0 }
 0x15a   :  { %v469_v41 = vpop.permute.xlu0 %468 }
 0x15b   :  { %1277 = vmatmul.mubr.msk.bf16.vlgmr.msra.gmra.mrb[8].mxu0 %vm277_vm2, %v1190_v11  ;;  %v474_v43 = vsel %vm277_vm2, %v469_v41, 0 }
 0x15c   :  { %1287 = vmatpush3.bf16.xpose.msra.mxu0 %v378_v39  ;;  %1288 = vmatprep.mubr.msk.bf16.mxu0 %vm1416_vm0, %v1415_v0  ;;  %v517_v44 = vpop.permute.xlu1 %516 }
 0x15d   :  { %1298 = vmatprep.subr.bf16.mxu0 %v1415_v0  ;;  %v522_v45 = vsel %vm277_vm2, %v517_v44, 0 }
 0x15e   :  { %v565_v46 = vpop.permute.xlu0 %564 }
 0x15f   :  { %1283 = vmatmul.mubr.msk.bf16.vlgmr.msra.gmra.mrb[8].mxu1 %vm277_vm2, %v1492_v21  ;;  %v570_v47 = vsel %vm277_vm2, %v565_v46, 0 }
 0x160   :  { %1293 = vmatpush3.bf16.xpose.msra.mxu1 %v426_v42  ;;  %1294 = vmatprep.mubr.msk.bf16.mxu1 %vm1416_vm0, %v1415_v0  ;;  %v613_v48 = vpop.permute.xlu1 %612 }
 0x161   :  { %1304 = vmatprep.subr.bf16.mxu1 %v1415_v0  ;;  %v618_v49 = vsel %vm277_vm2, %v613_v48, 0 }
 0x163   :  { %1289 = vmatmul.mubr.msk.bf16.vlgmr.msra.gmra.mrb[12].mxu0 %vm277_vm2, %v1487_v15 }
 0x164   :  { %1299 = vmatpush3.bf16.xpose.msra.mxu0 %v474_v43  ;;  %1300 = vmatprep.mubr.msk.bf16.mxu0 %vm1416_vm0, %v1415_v0  ;;  %v757_v50 = vpop.permute.xlu1 %756 }
 0x165   :  { %1310 = vmatprep.subr.bf16.mxu0 %v1415_v0  ;;  %v763_v51 = vsel %vm761_vm3, %v757_v50, 0 }
 0x167   :  { %1295 = vmatmul.mubr.msk.bf16.vlgmr.msra.gmra.mrb[12].mxu1 %vm277_vm2, %v1490_v19 }
 0x168   :  { %1305 = vmatpush3.bf16.xpose.msra.mxu1 %v522_v45  ;;  %1306 = vmatprep.mubr.msk.bf16.mxu1 %vm1416_vm0, %v1415_v0 }
 0x169   :  { %1316 = vmatprep.subr.bf16.mxu1 %v1415_v0 }
 0x16b   :  { %1301 = vmatmul.mubr.msk.bf16.vlgmr.msra.gmra.mrb[16].mxu0 %vm277_vm2, %v1496_v23 }
 0x16c   :  { %1311 = vmatpush3.bf16.xpose.msra.mxu0 %v570_v47  ;;  %1312 = vmatprep.mubr.msk.bf16.mxu0 %vm1416_vm0, %v1415_v0 }
 0x16d   :  { %1322 = vmatprep.subr.bf16.mxu0 %v1415_v0 }
 0x16f   :  { %1307 = vmatmul.mubr.msk.bf16.vlgmr.msra.gmra.mrb[16].mxu1 %vm277_vm2, %v1498_v28 }
 0x170   :  { %1317 = vmatpush3.bf16.xpose.msra.mxu1 %v618_v49  ;;  %1318 = vmatprep.mubr.msk.bf16.mxu1 %vm1416_vm0, %v1415_v0 }
 0x171   :  { %1328 = vmatprep.subr.bf16.mxu1 %v1415_v0 }
 0x173   :  { %1313 = vmatmul.mubr.msk.bf16.vlgmr.msra.gmra.mrb[20].mxu0 %vm277_vm2, %v1500_v29 }
 0x174   :  { %1323 = vmatpush3.bf16.msra.mxu0 %v763_v51  ;;  %1324 = vmatprep.mubr.msk.bf16.mxu0 %vm1416_vm0, %v1415_v0 }
 0x175   :  { %1334 = vmatprep.subr.bf16.mxu0 %v1415_v0 }
 0x177   :  { %1319 = vmatmul.mubr.msk.bf16.vlgmr.msra.gmra.mrb[20].mxu1 %vm277_vm2, %v1504_v33 }
 0x178   :  { %1330 = vmatprep.mubr.msk.bf16.mxu1 %vm1416_vm0, %v1415_v0 }
 0x22e   :  { %v318_v52 = vpop.f32.mrb[8].mxu0 }
 0x22f   :  { %v1278_v53 = vpop.f32.mrb[9].mxu0  ;;  %v660_v54 = vsel %vm277_vm2, %v318_v52, -inf }
 0x230   :  { %661 = vmax.xlane.f32.xlu0 %v660_v54  ;;  %v321_v55 = vpop.f32.mrb[10].mxu0 }
 0x231   :  { %v1279_v56 = vpop.f32.mrb[11].mxu0 }
 0x232   :  { %v366_v57 = vpop.f32.mrb[8].mxu1 }
 0x233   :  { %v1284_v58 = vpop.f32.mrb[9].mxu1  ;;  %v663_v59 = vsel %vm277_vm2, %v366_v57, -inf }
 0x234   :  { %v369_v60 = vpop.f32.mrb[10].mxu1  ;;  %664 = vmax.xlane.f32.xlu1 %v663_v59 }
 0x235   :  { %v1285_v61 = vpop.f32.mrb[11].mxu1 }
 0x236   :  { %v414_v62 = vpop.f32.mrb[12].mxu0 }
 0x237   :  { %v1290_v63 = vpop.f32.mrb[13].mxu0  ;;  %v666_v1 = vsel %vm277_vm2, %v414_v62, -inf }
 0x238   :  { %667 = vmax.xlane.f32.xlu0 %v666_v1  ;;  %v417_v2 = vpop.f32.mrb[14].mxu0 }
 0x239   :  { %v1291_v3 = vpop.f32.mrb[15].mxu0 }
 0x23a   :  { %v462_v4 = vpop.f32.mrb[12].mxu1 }
 0x23b   :  { %v1296_v5 = vpop.f32.mrb[13].mxu1  ;;  %v669_v6 = vsel %vm277_vm2, %v462_v4, -inf }
 0x23c   :  { %v465_v7 = vpop.f32.mrb[14].mxu1  ;;  %670 = vmax.xlane.f32.xlu0 %v669_v6 }
 0x23d   :  { %v1297_v8 = vpop.f32.mrb[15].mxu1 }
 0x23e   :  { %v1562_v9 = vpop.f32.mrb[16].mxu0 }
 0x23f   :  { %v1302_v10 = vpop.f32.mrb[17].mxu0  ;;  %v672_v11 = vsel %vm277_vm2, %v1562_v9, -inf }
 0x240   :  { %673 = vmax.xlane.f32.xlu1 %v672_v11  ;;  %v513_v12 = vpop.f32.mrb[18].mxu0 }
 0x241   :  { %v1303_v13 = vpop.f32.mrb[19].mxu0 }
 0x242   :  { %v1566_v14 = vpop.f32.mrb[16].mxu1 }
 0x243   :  { %v1308_v16 = vpop.f32.mrb[17].mxu1  ;;  %v675_v17 = vsel %vm277_vm2, %v1566_v14, -inf }
 0x244   :  { %v561_v18 = vpop.f32.mrb[18].mxu1  ;;  %676 = vmax.xlane.f32.xlu0 %v675_v17 }
 0x245   :  { %v1309_v20 = vpop.f32.mrb[19].mxu1 }
 0x246   :  { %v606_v22 = vpop.f32.mrb[20].mxu0 }
 0x247   :  { %v1314_v24 = vpop.f32.mrb[21].mxu0  ;;  %v678_v25 = vsel %vm277_vm2, %v606_v22, -inf }
 0x248   :  { %679 = vmax.xlane.f32.xlu1 %v678_v25  ;;  %v609_v26 = vpop.f32.mrb[22].mxu0 }
 0x249   :  { %v1315_v27 = vpop.f32.mrb[23].mxu0 }
 0x24a   :  { %v654_v30 = vpop.f32.mrb[20].mxu1 }
 0x24b   :  { %v1320_v31 = vpop.f32.mrb[21].mxu1  ;;  %v681_v32 = vsel %vm277_vm2, %v654_v30, -inf }
 0x24c   :  { %v657_v34 = vpop.f32.mrb[22].mxu1  ;;  %682 = vmax.xlane.f32.xlu0 %v681_v32 }
 0x24d   :  { %v1321_v35 = vpop.f32.mrb[23].mxu1 }
 0x259   :  { %853 = vrot.lane.b32.xlu1 %v1487_v15, %s1418_s26 }
 0x25d   :  { %901 = vrot.lane.b32.xlu1 %v1490_v19, %s1418_s26 }
 0x262   :  { %805 = vrot.lane.b32.xlu0 %v1492_v21, %s1418_s26 }
 0x2bd   :  { %v662_v36 = vpop.xlane.xlu0 %661 }
 0x2be   :  { %v684_v37 = vsub.f32 %v318_v52, %v662_v36 }
 0x2c0   :  { %v692_v38 = vmul.f32 1.442695, %v684_v37 }
 0x2c1   :  { %v665_v39 = vpop.xlane.xlu1 %664 }
 0x2c2   :  { %1383 = vpow2.f32 %v692_v38  ;;  %v685_v40 = vsub.f32 %v366_v57, %v665_v39 }
 0x2c4   :  { %v694_v41 = vmul.f32 1.442695, %v685_v40 }
 0x2c5   :  { %v668_v42 = vpop.xlane.xlu0 %667 }
 0x2c6   :  { %1385 = vpow2.f32 %v694_v41  ;;  %v686_v43 = vsub.f32 %v414_v62, %v668_v42 }
 0x2c8   :  { %v696_v44 = vmul.f32 1.442695, %v686_v43 }
 0x2c9   :  { %v671_v45 = vpop.xlane.xlu0 %670 }
 0x2ca   :  { %1387 = vpow2.f32 %v696_v44  ;;  %v687_v15 = vsub.f32 %v462_v4, %v671_v45 }
 0x2cc   :  { %v1384_v46 = vpop.eup %1383  ;;  %v698_v47 = vmul.f32 1.442695, %v687_v15 }
 0x2cd   :  { %v708_v19 = vsel %vm277_vm2, %v1384_v46, 0.0  ;;  %v674_v57 = vpop.xlane.xlu1 %673 }
 0x2ce   :  { %1389 = vpow2.f32 %v698_v47  ;;  %709 = vadd.xlane.f32.xlu1 %v708_v19  ;;  %v688_v58 = vsub.f32 %v1562_v9, %v674_v57 }
 0x2d0   :  { %v1386_v21 = vpop.eup %1385  ;;  %v700_v61 = vmul.f32 1.442695, %v688_v58 }
 0x2d1   :  { %v711_v48 = vsel %vm277_vm2, %v1386_v21, 0.0  ;;  %v677_v50 = vpop.xlane.xlu0 %676 }
 0x2d2   :  { %712 = vadd.xlane.f32.xlu0 %v711_v48  ;;  %v689_v60 = vsub.f32 %v1566_v14, %v677_v50  ;;  %1391 = vpow2.f32 %v700_v61 }
 0x2d4   :  { %v1580_v49 = vpop.eup %1387  ;;  %v702_v63 = vmul.f32 1.442695, %v689_v60 }
 0x2d5   :  { %v714_v51 = vsel %vm277_vm2, %v1580_v49, 0.0  ;;  %v680_v59 = vpop.xlane.xlu1 %679 }
 0x2d6   :  { %715 = vadd.xlane.f32.xlu1 %v714_v51  ;;  %v690_v62 = vsub.f32 %v606_v22, %v680_v59  ;;  %1393 = vpow2.f32 %v702_v63 }
 0x2d8   :  { %v1584_v52 = vpop.eup %1389  ;;  %v704_v1 = vmul.f32 1.442695, %v690_v62 }
 0x2d9   :  { %v683_v53 = vpop.xlane.xlu0 %682  ;;  %v717_v54 = vsel %vm277_vm2, %v1584_v52, 0.0  ;;  %v854_v10 = vpop.permute.xlu1 %853 }
 0x2da   :  { %718 = vadd.xlane.f32.xlu0 %v717_v54  ;;  %v691_v2 = vsub.f32 %v654_v30, %v683_v53  ;;  %1395 = vpow2.f32 %v704_v1  ;;  %v859_v24 = vsel %vm761_vm3, %v854_v10, 0 }
 0x2dc   :  { %v706_v3 = vmul.f32 1.442695, %v691_v2 }
 0x2dd   :  { %v806_v55 = vpop.permute.xlu0 %805  ;;  %v902_v11 = vpop.permute.xlu1 %901 }
 0x2de   :  { %v811_v56 = vsel %vm761_vm3, %v806_v55, 0  ;;  %1397 = vpow2.f32 %v706_v3  ;;  %v907_v26 = vsel %vm761_vm3, %v902_v11, 0 }
 0x2df   :  { %1329 = vmatpush3.bf16.msra.mxu1 %v811_v56 }
 0x2e0   :  { %1340 = vmatprep.subr.bf16.mxu1 %v1415_v0 }
 0x2e7   :  { %997 = vrot.lane.b32.xlu1 %v1498_v28, %s1418_s26  ;;  %v1596_v28 = vpop.eup %1391 }
 0x2e8   :  { %v1598_v4 = vpop.eup %1393 }
 0x2e9   :  { %v1602_v5 = vpop.eup %1395  ;;  %v723_v6 = vsel %vm277_vm2, %v1598_v4, 0.0 }
 0x2ea   :  { %v726_v7 = vsel %vm277_vm2, %v1602_v5, 0.0  ;;  %v1608_v8 = vpop.eup %1397 }
 0x2eb   :  { %v729_v9 = vsel %vm277_vm2, %v1608_v8, 0.0 }
 0x2f0   :  { %949 = vrot.lane.b32.xlu0 %v1496_v23, %s1418_s26  ;;  %v720_v23 = vsel %vm277_vm2, %v1596_v28, 0.0 }
 0x30b   :  { %721 = vadd.xlane.f32.xlu1 %v720_v23 }
 0x30f   :  { %724 = vadd.xlane.f32.xlu0 %v723_v6  ;;  %727 = vadd.xlane.f32.xlu1 %v726_v7 }
 0x313   :  { %730 = vadd.xlane.f32.xlu0 %v729_v9 }
 0x320   :  { %1093 = vrot.lane.b32.xlu1 %v1504_v33, %s1418_s26 }
 0x329   :  { %1045 = vrot.lane.b32.xlu0 %v1500_v29, %s1418_s26 }
 0x35b   :  { %v710_v12 = vpop.xlane.xlu1 %709 }
 0x35c   :  { %1399 = vrcp.f32 %v710_v12 }
 0x35f   :  { %v713_v13 = vpop.xlane.xlu0 %712 }
 0x360   :  { %1401 = vrcp.f32 %v713_v13 }
 0x363   :  { %v716_v14 = vpop.xlane.xlu1 %715 }
 0x364   :  { %1403 = vrcp.f32 %v716_v14 }
 0x366   :  { %v1400_v16 = vpop.eup %1399 }
 0x367   :  { %v740_v17 = vmul.f32 %v1400_v16, %v1384_v46  ;;  %v719_v18 = vpop.xlane.xlu0 %718  ;;  %v998_v36 = vpop.permute.xlu1 %997 }
 0x368   :  { %1405 = vrcp.f32 %v719_v18  ;;  %v1003_v38 = vsel %vm761_vm3, %v998_v36, 0 }
 0x369   :  { %v748_v20 = vpack.c.bf16 %v740_v17, %v740_v17 }
 0x36a   :  { %v1402_v22 = vpop.eup %1401 }
 0x36b   :  { %v741_v33 = vmul.f32 %v1402_v22, %v1386_v21  ;;  %1325 = vmatmul.mubr.msk.bf16.vlgmr.msra.gmra.mrb[24].mxu0 %vm277_vm2, %v748_v20  ;;  %v950_v30 = vpop.permute.xlu0 %949 }
 0x36c   :  { %1335 = vmatpush3.bf16.msra.mxu0 %v859_v24  ;;  %1336 = vmatprep.mubr.msk.bf16.mxu0 %vm1416_vm0, %v1415_v0  ;;  %v955_v35 = vsel %vm761_vm3, %v950_v30, 0 }
 0x36d   :  { %v749_v29 = vpack.c.bf16 %v741_v33, %v741_v33  ;;  %1346 = vmatprep.subr.bf16.mxu0 %v1415_v0 }
 0x36e   :  { %v1404_v25 = vpop.eup %1403 }
 0x36f   :  { %v742_v27 = vmul.f32 %v1404_v25, %v1580_v49  ;;  %1331 = vmatmul.mubr.msk.bf16.vlgmr.msra.gmra.mrb[24].mxu1 %vm277_vm2, %v749_v29 }
 0x370   :  { %1341 = vmatpush3.bf16.msra.mxu1 %v907_v26  ;;  %1342 = vmatprep.mubr.msk.bf16.mxu1 %vm1416_vm0, %v1415_v0 }
 0x371   :  { %v750_v31 = vpack.c.bf16 %v742_v27, %v742_v27  ;;  %1352 = vmatprep.subr.bf16.mxu1 %v1415_v0 }
 0x372   :  { %v1406_v32 = vpop.eup %1405 }
 0x373   :  { %v743_v34 = vmul.f32 %v1406_v32, %v1584_v52  ;;  %1337 = vmatmul.mubr.msk.bf16.vlgmr.msra.gmra.mrb[28].mxu0 %vm277_vm2, %v750_v31 }
 0x374   :  { %1347 = vmatpush3.bf16.msra.mxu0 %v955_v35  ;;  %1348 = vmatprep.mubr.msk.bf16.mxu0 %vm1416_vm0, %v1415_v0 }
 0x375   :  { %v751_v37 = vpack.c.bf16 %v743_v34, %v743_v34  ;;  %1358 = vmatprep.subr.bf16.mxu0 %v1415_v0 }
 0x377   :  { %1343 = vmatmul.mubr.msk.bf16.vlgmr.msra.gmra.mrb[28].mxu1 %vm277_vm2, %v751_v37 }
 0x378   :  { %1353 = vmatpush3.bf16.msra.mxu1 %v1003_v38  ;;  %1354 = vmatprep.mubr.msk.bf16.mxu1 %vm1416_vm0, %v1415_v0 }
 0x379   :  { %1364 = vmatprep.subr.bf16.mxu1 %v1415_v0 }
 0x398   :  { %v722_v39 = vpop.xlane.xlu1 %721 }
 0x399   :  { %1407 = vrcp.f32 %v722_v39 }
 0x39c   :  { %v725_v40 = vpop.xlane.xlu0 %724  ;;  %v728_v41 = vpop.xlane.xlu1 %727 }
 0x39d   :  { %1409 = vrcp.f32 %v725_v40 }
 0x39e   :  { %1411 = vrcp.f32 %v728_v41 }
 0x3a0   :  { %v731_v42 = vpop.xlane.xlu0 %730  ;;  %v1094_v48 = vpop.permute.xlu1 %1093 }
 0x3a1   :  { %1413 = vrcp.f32 %v731_v42  ;;  %v1099_v52 = vsel %vm761_vm3, %v1094_v48, 0 }
 0x3a3   :  { %v1408_v43 = vpop.eup %1407 }
 0x3a4   :  { %v744_v44 = vmul.f32 %v1408_v43, %v1596_v28  ;;  %v1046_v45 = vpop.permute.xlu0 %1045 }
 0x3a5   :  { %v1051_v21 = vsel %vm761_vm3, %v1046_v45, 0 }
 0x3a6   :  { %v752_v15 = vpack.c.bf16 %v744_v44, %v744_v44 }
 0x3a7   :  { %v1410_v46 = vpop.eup %1409 }
 0x3a8   :  { %v1412_v47 = vpop.eup %1411  ;;  %v745_v19 = vmul.f32 %v1410_v46, %v1598_v4  ;;  %1349 = vmatmul.mubr.msk.bf16.vlgmr.msra.gmra.mrb[32].mxu0 %vm277_vm2, %v752_v15 }
 0x3a9   :  { %1359 = vmatpush3.bf16.msra.mxu0 %v1051_v21  ;;  %1360 = vmatprep.mubr.msk.bf16.mxu0 %vm1416_vm0, %v1415_v0  ;;  %v746_v49 = vmul.f32 %v1412_v47, %v1602_v5 }
 0x3aa   :  { %v753_v50 = vpack.c.bf16 %v745_v19, %v745_v19 }
 0x3ab   :  { %v1414_v51 = vpop.eup %1413  ;;  %v754_v54 = vpack.c.bf16 %v746_v49, %v746_v49 }
 0x3ac   :  { %1355 = vmatmul.mubr.msk.bf16.vlgmr.msra.gmra.mrb[32].mxu1 %vm277_vm2, %v753_v50  ;;  %v747_v53 = vmul.f32 %v1414_v51, %v1608_v8 }
 0x3ad   :  { %1365 = vmatpush3.bf16.msra.mxu1 %v1099_v52  ;;  %1366 = vmatprep.mubr.msk.bf16.mxu1 %vm1416_vm0, %v1415_v0 }
 0x3ae   :  { %v755_v55 = vpack.c.bf16 %v747_v53, %v747_v53 }
 0x3b0   :  { %1361 = vmatmul.mubr.msk.bf16.vlgmr.msra.gmra.mrb[36].mxu0 %vm277_vm2, %v754_v54 }
 0x3b4   :  { %1367 = vmatmul.mubr.msk.bf16.vlgmr.msra.gmra.mrb[36].mxu1 %vm277_vm2, %v755_v55 }
 0x43e   :  { %v799_v56 = vpop.f32.mrb[24].mxu0 }
 0x43f   :  { %1141 = vst.msk [vmem:[%s1686_s2] sm:$0xff] %vm277_vm2, %v799_v56  ;;  %v1326_v57 = vpop.f32.mrb[25].mxu0 }
 0x440   :  { %v802_v58 = vpop.f32.mrb[26].mxu0 }
 0x441   :  { %v1327_v59 = vpop.f32.mrb[27].mxu0 }
 0x442   :  { %v847_v60 = vpop.f32.mrb[24].mxu1 }
 0x443   :  { %1142 = vst.msk [vmem:[%s1686_s2 + $0x8] sm:$0xff] %vm277_vm2, %v847_v60  ;;  %v1332_v0 = vpop.f32.mrb[25].mxu1 }
 0x444   :  { %v850_v61 = vpop.f32.mrb[26].mxu1 }
 0x445   :  { %v1333_v62 = vpop.f32.mrb[27].mxu1 }
 0x446   :  { %v895_v63 = vpop.f32.mrb[28].mxu0 }
 0x447   :  { %1143 = vst.msk [vmem:[%s1686_s2 + $0x10] sm:$0xff] %vm277_vm2, %v895_v63  ;;  %v1338_v1 = vpop.f32.mrb[29].mxu0 }
 0x448   :  { %v898_v2 = vpop.f32.mrb[30].mxu0 }
 0x449   :  { %v1339_v3 = vpop.f32.mrb[31].mxu0 }
 0x44a   :  { %v943_v28 = vpop.f32.mrb[28].mxu1 }
 0x44b   :  { %1144 = vst.msk [vmem:[%s1686_s2 + $0x18] sm:$0xff] %vm277_vm2, %v943_v28  ;;  %v1344_v4 = vpop.f32.mrb[29].mxu1 }
 0x44c   :  { %v946_v23 = vpop.f32.mrb[30].mxu1 }
 0x44d   :  { %v1345_v5 = vpop.f32.mrb[31].mxu1 }
 0x47b   :  { %v991_v6 = vpop.f32.mrb[32].mxu0 }
 0x47c   :  { %1145 = vst.msk [vmem:[%s1686_s2 + $0x20] sm:$0xff] %vm277_vm2, %v991_v6  ;;  %v1350_v7 = vpop.f32.mrb[33].mxu0 }
 0x47d   :  { %v994_v8 = vpop.f32.mrb[34].mxu0 }
 0x47e   :  { %v1351_v9 = vpop.f32.mrb[35].mxu0 }
 0x47f   :  { %v1039_v10 = vpop.f32.mrb[32].mxu1 }
 0x480   :  { %1146 = vst.msk [vmem:[%s1686_s2 + $0x28] sm:$0xff] %vm277_vm2, %v1039_v10  ;;  %v1356_v11 = vpop.f32.mrb[33].mxu1 }
 0x481   :  { %v1042_v12 = vpop.f32.mrb[34].mxu1 }
 0x482   :  { %v1357_v13 = vpop.f32.mrb[35].mxu1 }
 0x483   :  { %v1087_v14 = vpop.f32.mrb[36].mxu0 }
 0x484   :  { %1147 = vst.msk [vmem:[%s1686_s2 + $0x30] sm:$0xff] %vm277_vm2, %v1087_v14  ;;  %v1362_v16 = vpop.f32.mrb[37].mxu0 }
 0x485   :  { %v1090_v17 = vpop.f32.mrb[38].mxu0 }
 0x486   :  { %v1363_v18 = vpop.f32.mrb[39].mxu0 }
 0x487   :  { %v1135_v20 = vpop.f32.mrb[36].mxu1 }
 0x488   :  { %1148 = vst.msk [vmem:[%s1686_s2 + $0x38] sm:$0xff] %vm277_vm2, %v1135_v20  ;;  %v1368_v22 = vpop.f32.mrb[37].mxu1 }
 0x489   :  { %v1138_v24 = vpop.f32.mrb[38].mxu1 }
 0x48a   :  { %v1369_v33 = vpop.f32.mrb[39].mxu1 }

</bundles_post_ra>
